<compile_context>
chip_gen: v5e
topology: v5e:2x2
jax: 0.10.0
libtpu: 0.0.40
codegen_flags: <defaults>
</compile_context>

<pallas_src>
import jax
import jax.numpy as jnp
from jax.experimental import pallas as pl
from jax.experimental.pallas import tpu as pltpu


def gcn_embedding_kernel(a_ref, x_ref, p_ref, o_ref):
    gb, n, _ = a_ref.shape
    in_f = x_ref.shape[-1]
    h_f = p_ref.shape[-1]

    a = a_ref[...]                                          # [GB, N, N]
    x = x_ref[...]                                          # [GB, N, IN]

    # Packed parameters (resident in VMEM across the whole grid).
    w1 = p_ref[0:in_f, :]                                   # [IN, H]
    w2 = p_ref[in_f:in_f + h_f, :]                          # [H, H]
    b1 = p_ref[in_f + h_f:in_f + h_f + 1, :]                # [1, H]
    b2 = p_ref[in_f + h_f + 1:in_f + h_f + 2, :]            # [1, H]

    # --- GraphConv 1, aggregate-first: (A @ X) @ W1 (contract the narrow IN dim).
    ax = jnp.einsum('gnm,gmf->gnf', a, x,
                    preferred_element_type=jnp.float32)     # [GB, N, IN]
    h = jnp.dot(ax.reshape(gb * n, in_f), w1,
                preferred_element_type=jnp.float32)         # [GB*N, H]
    h = jnp.maximum(h + b1, 0.0)                            # bias + ReLU (VPU, f32)

    # --- GraphConv 2 weight matmul as one well-shaped [GB*N, H] x [H, H] MXU pass.
    hw2 = jnp.dot(h, w2,
                  preferred_element_type=jnp.float32).reshape(gb, n, h_f)

    # --- AvgPooling fused into GraphConv 2:
    #     mean_n(A @ hw2 + b2) == (colmean(A) @ hw2) + b2.
    # colmean(A) is an XLU sublane reduce that overlaps the hw2 MXU pass;
    # the only remaining tail work is one tiny batched M=1 matvec.
    r = jnp.mean(a, axis=1, keepdims=True)                  # [GB, 1, N]
    pooled = jnp.einsum('gxn,gnh->gxh', r, hw2,
                        preferred_element_type=jnp.float32)  # [GB, 1, H]
    o_ref[...] = pooled + b2                                 # [GB, 1, H]


def gcn_embedding(a_norm, x, w1, b1, w2, b2, *, graphs_per_step=4):
    """Batched GCNEmbedding forward.

    a_norm: [G, N, N] (or [N, N] for a single graph), x: [G, N, IN].
    Returns per-graph pooled embeddings [G, H].
    """
    if a_norm.ndim == 2:                        # single-graph convenience path
        a_norm, x = a_norm[None], x[None]

    g_total, n, _ = a_norm.shape
    in_feats = x.shape[-1]
    h_feats = w2.shape[-1]

    # Graphs processed per grid step (must divide G).
    gb = max(1, min(graphs_per_step, g_total))
    while g_total % gb:
        gb -= 1
    num_blocks = g_total // gb

    # Pack all parameters into one array -> a single resident VMEM block.
    params = jnp.concatenate(
        [w1, w2, b1.reshape(1, h_feats), b2.reshape(1, h_feats)], axis=0
    ).astype(jnp.float32)                                   # [IN + H + 2, H]

    # Advisory cost hint for XLA's scheduler (includes the output write).
    flops = 2 * g_total * (
        n * n * in_feats + n * in_feats * h_feats + n * h_feats * h_feats + n * h_feats
    )
    bytes_accessed = 4 * (
        g_total * n * n + g_total * n * in_feats + params.size + g_total * h_feats
    )
    cost = pl.CostEstimate(flops=flops, transcendentals=0,
                           bytes_accessed=bytes_accessed)

    grid_spec = pltpu.PrefetchScalarGridSpec(
        num_scalar_prefetch=0,
        grid=(num_blocks,),
        in_specs=[
            pl.BlockSpec((gb, n, n), lambda b: (b, 0, 0)),          # A_norm block
            pl.BlockSpec((gb, n, in_feats), lambda b: (b, 0, 0)),   # X block
            pl.BlockSpec(params.shape, lambda b: (0, 0)),           # params (resident)
        ],
        out_specs=pl.BlockSpec((gb, 1, h_feats), lambda b: (b, 0, 0)),
    )

    out = pl.pallas_call(
        gcn_embedding_kernel,
        out_shape=jax.ShapeDtypeStruct((g_total, 1, h_feats), jnp.float32),
        grid_spec=grid_spec,
        compiler_params=pltpu.CompilerParams(
            dimension_semantics=("parallel",)),   # graph-block axis is independent
        cost_estimate=cost,
    )(a_norm, x, params)

    return out.reshape(g_total, h_feats)


def build_normalized_adjacency(key, n):
    """Deterministic random undirected graph with self-loops, 'both' norm (glue)."""
    logits = jax.random.uniform(key, (n, n))
    adj = (logits < 0.15).astype(jnp.float32)
    adj = jnp.maximum(adj, adj.T)                          # undirected
    adj = jnp.maximum(adj, jnp.eye(n, dtype=jnp.float32))  # self-loops (no zero degree)
    deg = jnp.sum(adj, axis=1)
    d_inv_sqrt = 1.0 / jnp.sqrt(deg)
    return adj * d_inv_sqrt[:, None] * d_inv_sqrt[None, :]


if __name__ == "__main__":
    key = jax.random.PRNGKey(0)
    k_a, k_x, k_w1, k_b1, k_w2, k_b2 = jax.random.split(key, 6)

    G = 8           # graphs in the batch (grid axis)
    N = 32          # nodes per graph
    IN_FEATS = 16
    H_FEATS = 32

    a_keys = jax.random.split(k_a, G)
    a_norm = jax.vmap(lambda k: build_normalized_adjacency(k, N))(a_keys)   # [G, N, N]
    x = jax.random.normal(k_x, (G, N, IN_FEATS), dtype=jnp.float32)

    # Deterministic parameter init (GraphConv: weight [in, out], bias [out]).
    w1 = jax.random.normal(k_w1, (IN_FEATS, H_FEATS), dtype=jnp.float32) / jnp.sqrt(IN_FEATS)
    b1 = 0.1 * jax.random.normal(k_b1, (1, H_FEATS), dtype=jnp.float32)
    w2 = jax.random.normal(k_w2, (H_FEATS, H_FEATS), dtype=jnp.float32) / jnp.sqrt(H_FEATS)
    b2 = 0.1 * jax.random.normal(k_b2, (1, H_FEATS), dtype=jnp.float32)

    out = gcn_embedding(a_norm, x, w1, b1, w2, b2, graphs_per_step=4)
    out = jax.block_until_ready(out)

    # Pure-JAX per-graph reference in the original, un-fused formulation.
    def ref_one(a, xg):
        h = jnp.maximum(a @ (xg @ w1) + b1, 0.0)
        h = a @ (h @ w2) + b2
        return jnp.mean(h, axis=0)

    ref = jax.vmap(ref_one)(a_norm, x)

    assert out.shape == (G, H_FEATS)
    assert jnp.allclose(out, ref, atol=1e-4, rtol=1e-4)

    print("KERNEL_OK")
</pallas_src>

<mosaic_0001>
module attributes {stable_mosaic.version = 11 : i64} {
  func.func @gcn_embedding_kernel(%arg0: i32, %arg1: memref<4x32x32xf32, #tpu.memory_space<vmem>>, %arg2: memref<4x32x16xf32, #tpu.memory_space<vmem>>, %arg3: memref<50x32xf32, #tpu.memory_space<vmem>>, %arg4: memref<4x1x32xf32, #tpu.memory_space<vmem>>) attributes {dimension_semantics = [#tpu.dimension_semantics<parallel>], iteration_bounds = array<i64: 2>, scalar_prefetch = 0 : i64, scratch_operands = 0 : i64, tpu.core_type = #tpu.core_type<tc>, window_params = [{transform_indices = @transform_0, window_bounds = array<i64: 4, 32, 32>}, {transform_indices = @transform_1, window_bounds = array<i64: 4, 32, 16>}, {pipeline_mode = #tpu.pipeline_mode<synchronous>, transform_indices = @transform_2, window_bounds = array<i64: 50, 32>}, {transform_indices = @transform_3, window_bounds = array<i64: 4, 1, 32>}]} {
    %c0 = arith.constant 0 : index
    %c0_0 = arith.constant 0 : index
    %c0_1 = arith.constant 0 : index
    %0 = vector.load %arg1[%c0, %c0_0, %c0_1] : memref<4x32x32xf32, #tpu.memory_space<vmem>>, vector<4x32x32xf32>
    %c0_2 = arith.constant 0 : index
    %c0_3 = arith.constant 0 : index
    %c0_4 = arith.constant 0 : index
    %1 = vector.load %arg2[%c0_2, %c0_3, %c0_4] : memref<4x32x16xf32, #tpu.memory_space<vmem>>, vector<4x32x16xf32>
    %c0_5 = arith.constant 0 : index
    %c0_6 = arith.constant 0 : index
    %2 = vector.load %arg3[%c0_5, %c0_6] : memref<50x32xf32, #tpu.memory_space<vmem>>, vector<16x32xf32>
    %c16 = arith.constant 16 : index
    %c0_7 = arith.constant 0 : index
    %3 = vector.load %arg3[%c16, %c0_7] : memref<50x32xf32, #tpu.memory_space<vmem>>, vector<32x32xf32>
    %c48 = arith.constant 48 : index
    %c0_8 = arith.constant 0 : index
    %4 = vector.load %arg3[%c48, %c0_8] : memref<50x32xf32, #tpu.memory_space<vmem>>, vector<1x32xf32>
    %c49 = arith.constant 49 : index
    %c0_9 = arith.constant 0 : index
    %5 = vector.load %arg3[%c49, %c0_9] : memref<50x32xf32, #tpu.memory_space<vmem>>, vector<1x32xf32>
    "tpu.trace_start"() <{level = 10 : i32, message = "gnm,gmf->gnf"}> : () -> ()
    %cst = arith.constant dense<0.000000e+00> : vector<4x32x16xf32>
    %6 = tpu.matmul %0, %1, %cst {dimension_numbers = #tpu.dot_dimension_numbers<[2], [1], [1], [2], [0, 0, 0, 1, 1, 2], [0], [0]>} : vector<4x32x32xf32>, vector<4x32x16xf32>, vector<4x32x16xf32> -> vector<4x32x16xf32>
    "tpu.trace_stop"() : () -> ()
    %7 = vector.shape_cast %6 : vector<4x32x16xf32> to vector<128x16xf32>
    %cst_10 = arith.constant dense<0.000000e+00> : vector<128x32xf32>
    %8 = tpu.matmul %7, %2, %cst_10 {dimension_numbers = #tpu.dot_dimension_numbers<[1], [0], [0], [1], [0, 0, 1, 1], [], []>} : vector<128x16xf32>, vector<16x32xf32>, vector<128x32xf32> -> vector<128x32xf32>
    %9 = vector.broadcast %4 : vector<1x32xf32> to vector<128x32xf32>
    %10 = arith.addf %8, %9 : vector<128x32xf32>
    %cst_11 = arith.constant 0.000000e+00 : f32
    %11 = vector.broadcast %cst_11 : f32 to vector<128x32xf32>
    %12 = arith.maximumf %10, %11 : vector<128x32xf32>
    %cst_12 = arith.constant dense<0.000000e+00> : vector<128x32xf32>
    %13 = tpu.matmul %12, %3, %cst_12 {dimension_numbers = #tpu.dot_dimension_numbers<[1], [0], [0], [1], [0, 0, 1, 1], [], []>} : vector<128x32xf32>, vector<32x32xf32>, vector<128x32xf32> -> vector<128x32xf32>
    %14 = vector.shape_cast %13 : vector<128x32xf32> to vector<4x32x32xf32>
    %cst_13 = arith.constant dense<0.000000e+00> : vector<4x32xf32>
    %15 = vector.multi_reduction <add>, %0, %cst_13 [1] : vector<4x32x32xf32> to vector<4x32xf32>
    %16 = vector.shape_cast %15 : vector<4x32xf32> to vector<4x1x32xf32>
    %cst_14 = arith.constant 3.200000e+01 : f32
    %17 = vector.broadcast %cst_14 : f32 to vector<4x1x32xf32>
    %18 = arith.divf %16, %17 : vector<4x1x32xf32>
    "tpu.trace_start"() <{level = 10 : i32, message = "gxn,gnh->gxh"}> : () -> ()
    %cst_15 = arith.constant dense<0.000000e+00> : vector<4x1x32xf32>
    %19 = tpu.matmul %18, %14, %cst_15 {dimension_numbers = #tpu.dot_dimension_numbers<[2], [1], [1], [2], [0, 0, 0, 1, 1, 2], [0], [0]>} : vector<4x1x32xf32>, vector<4x32x32xf32>, vector<4x1x32xf32> -> vector<4x1x32xf32>
    "tpu.trace_stop"() : () -> ()
    %20 = vector.shape_cast %5 : vector<1x32xf32> to vector<1x1x32xf32>
    %21 = vector.broadcast %20 : vector<1x1x32xf32> to vector<4x1x32xf32>
    %22 = arith.addf %19, %21 : vector<4x1x32xf32>
    %c0_16 = arith.constant 0 : index
    %c0_17 = arith.constant 0 : index
    %c0_18 = arith.constant 0 : index
    %23 = vector.load %arg4[%c0_16, %c0_17, %c0_18] : memref<4x1x32xf32, #tpu.memory_space<vmem>>, vector<4x1x32xf32>
    tpu.vector_store %arg4[%c0_16, %c0_17, %c0_18], %22 {strides = array<i32>} : memref<4x1x32xf32, #tpu.memory_space<vmem>>, vector<4x1x32xf32>,
    return
  }
  func.func @transform_0(%arg0: i32) -> (i32, i32, i32) {
    %c0_i32 = arith.constant 0 : i32
    %c0_i32_0 = arith.constant 0 : i32
    %c0_i32_1 = arith.constant 0 : i32
    return %arg0, %c0_i32, %c0_i32_0 : i32, i32, i32
  }
  func.func @transform_1(%arg0: i32) -> (i32, i32, i32) {
    %c0_i32 = arith.constant 0 : i32
    %c0_i32_0 = arith.constant 0 : i32
    %c0_i32_1 = arith.constant 0 : i32
    return %arg0, %c0_i32, %c0_i32_0 : i32, i32, i32
  }
  func.func @transform_2(%arg0: i32) -> (i32, i32) {
    %c0_i32 = arith.constant 0 : i32
    %c0_i32_0 = arith.constant 0 : i32
    %c0_i32_1 = arith.constant 0 : i32
    return %c0_i32, %c0_i32_0 : i32, i32
  }
  func.func @transform_3(%arg0: i32) -> (i32, i32, i32) {
    %c0_i32 = arith.constant 0 : i32
    %c0_i32_0 = arith.constant 0 : i32
    %c0_i32_1 = arith.constant 0 : i32
    return %arg0, %c0_i32, %c0_i32_0 : i32, i32, i32
  }
}

</mosaic_0001>

<bundles_post_ra>
// kernel: tpu_custom_call.1
= control target key start
LH: loop header
LB: loop body
LE: loop exit
PB: predicated region body
PF: predicated region fallthrough
CT: control target
= control target key end

     0   :  { %8 = vsyncpa [#allocation3], 0  ;;  %s1360_s0 = inlined_call_operand.vmem [shape: f32[8,32,32], index: 0, kind: input, shape index: {}]   ;;  %s1361_s1 = inlined_call_operand.vmem [shape: f32[8,32,16], index: 1, kind: input, shape index: {}]   ;;  %s1362_s2 = inlined_call_operand.vmem [shape: f32[50,32], index: 2, kind: input, shape index: {}]   ;;  %s1363_s3 = inlined_call_operand.hbm [shape: f32[8,1,32], index: 3, kind: output, shape index: {}]  }
   0x1   :  { %10 = vsyncpa [#allocation3 + $0x1], 0  ;;  %s1105_s12 = smov 0   ;;  %s1107_s13 = smov 0  }
   0x2   :  { %s1109_s14 = smov 0   ;;  %s1111_s15 = smov 0  }
   0x3 LB: > { %s897_s16 = sadd.s32 4294967295, %s1080_s15   ;;  %s898_s17 = sadd.s32 4294967294, %s1080_s15   ;;  %s1080_s15 = sphi %s1111_s15, %s1369_s15   ;;  %s1076_s14 = sphi %s1109_s14, %s1368_s14   ;;  %s1072_s13 = sphi %s1107_s13, %s1367_s13   ;;  %s1068_s12 = sphi %s1105_s12, %s1366_s12  }
   0x4   : > { %s1128_s18 = sadd.s32 1, %s1080_s15   ;;  %s96_s19 = sadd.s32 1, %s1076_s14 }
   0x5   : > { %s93_s20 = ssub.s32 %s1080_s15, %s1128_s18  ;;  %p106_p0 = scmp.ne.s32.totalorder %s1076_s14, %s1072_s13 }
   0x6   : > { %p94_p1 = scmp.eq.s32.totalorder %s93_s20, 0  ;;  %p107_p2 = scmp.eq.s32.totalorder %s897_s16, 1 }
   0x7   : > { %p112_p3 = scmp.ne.s32.totalorder %s1072_s13, %s1068_s12  ;;  %p113_p4 = scmp.eq.s32.totalorder %s898_s17, 1 }
   0x8   : > { %s1138_s21 = scalar_select %p94_p1, %s1076_s14, %s96_s19  }
   0x9   : > { %p1140_p5 = por %p107_p2, %p106_p0  ;;  %p1144_p6 = por %p113_p4, %p112_p3 }
   0xa   : > { %p901_p7 = scmp.ge.s32.totalorder %s1080_s15, 1  ;;  %p154_p8 = scmp.lt.s32.totalorder %s1080_s15, 3 }
   0xc   : > { %p155_p9 = pnand %p901_p7, %p154_p8 }
   0xd   : > { %s1150_s24 = sshll.u32 (!%p155_p9), %s897_s16, 2 }
   0xe   : > { %158 = sbr.rel (%p155_p9) target bundleno = 633 (0x279), region = 32  ;;  %p186_p10 = scmp.lt.s32.totalorder (!%p155_p9), %s1150_s24, 7 }
   0xf   : > { %s820_s9 = scalar_lea.hbm (!%p155_p9), %s1363_s3, %s1150_s24 }
  0x10   : > { %s823_s11 = sshll.u32 (!%p155_p9), %s820_s9, 4  ;;  %s824_s11 = int_to_ptr.hbm [resolvable:$true] %s823_s11 }
  0x11   : > { %s1032_s17 = sshra.s32 (!%p155_p9), %s824_s11, 4  ;;  %s1033_s17 = int_to_ptr.hbm [resolvable:$true] %s1032_s17 }
  0x12   : > { %s1034_s19 = scalar_lea.hbm (!%p155_p9), %s1033_s17, 4  ;;  %p1039_p0 = scmp.lt.s32.totalorder (!%p155_p9), %s1033_s17, %s1363_s3 }
  0x13   : > { %s187_s25 = scalar_select %p186_p10, %s1150_s24, 7  ;;  %vm240_vm0 = vcmask 261120   ;;  %v233_v47 = vld [vmem:[%s1362_s2 + $0x8] sm:$0xff]  ;;  %v232_v61 = vld [vmem:[%s1362_s2] sm:$0xff]  ;;  %vm406_vm1 = vcmask 130048   ;;  %vm804_vm3 = vcmask 253952  }
  0x14   : > { %p1035_p11 = scmp.ne.s32.totalorder %s1033_s17, %s1034_s19  ;;  %s1038_s24 = scalar_lea.hbm %s1363_s3, 8 }
  0x15   : > { %s965_s26 = sshll.u32 %s187_s25, 5  ;;  %p1040_p1 = scmp.lt.s32.totalorder %s1038_s24, %s1034_s19 }
  0x16   : > { %s1157_s29 = scalar_lea.vmem %s1361_s1, %s965_s26  ;;  %s1162_s5 = scalar_lea.vmem %s1360_s0, %s965_s26 }
  0x17   : > { %v219_v0 = vld [vmem:[%s1157_s29 + $0x18] sm:$0xff]  ;;  %v218_v1 = vld [vmem:[%s1157_s29 + $0x10] sm:$0xff]  ;;  %v200_v2 = vld [vmem:[%s1162_s5] sm:$0xff]  ;;  %p1036_p12 = pnand %p1035_p11, %p1140_p5  ;;  %p1041_p2 = por %p1040_p1, %p1039_p0 }
  0x18   : > { %265 = vmatpush.msra.mxu0 %v219_v0  ;;  %v227_v3 = vld [vmem:[%s1157_s29 + $0x58] sm:$0xff]  ;;  %v217_v4 = vld [vmem:[%s1157_s29 + $0x8] sm:$0xff]  ;;  %v649_v5 = vsel %vm240_vm0, %v200_v2, 0.0  ;;  %v226_v6 = vld [vmem:[%s1157_s29 + $0x50] sm:$0xff] }
  0x19   : > { %347 = vmatpush.msra.mxu2 %v227_v3  ;;  %v225_v7 = vld [vmem:[%s1157_s29 + $0x48] sm:$0xff]  ;;  %v208_v9 = vld [vmem:[%s1162_s5 + $0x40] sm:$0xff]  ;;  %v1177_v10 = vld [vmem:[%s1162_s5 + $0x10] sm:$0xff]  ;;  %p1037_p13 = pneg %p1036_p12 }
  0x1a   : > { %266 = vmatpush.msra.mxu0 %v218_v1  ;;  %v1173_v8 = vld [vmem:[%s1162_s5 + $0x8] sm:$0xff]  ;;  %v216_v11 = vld [vmem:[%s1157_s29] sm:$0xff]  ;;  %v675_v13 = vsel %vm240_vm0, %v208_v9, 0.0  ;;  %v652_v14 = vsel %vm240_vm0, %v1177_v10, 0.0  ;;  %v1189_v16 = vld [vmem:[%s1162_s5 + $0x50] sm:$0xff] }
  0x1b   : > { %348 = vmatpush.msra.mxu2 %v226_v6  ;;  %v650_v12 = vsel %vm240_vm0, %v1173_v8, 0.0  ;;  %v1186_v15 = vld [vmem:[%s1162_s5 + $0x48] sm:$0xff]  ;;  %v224_v17 = vld [vmem:[%s1157_s29 + $0x40] sm:$0xff]  ;;  %v1195_v20 = vld [vmem:[%s1162_s5 + $0x18] sm:$0xff]  ;;  %v678_v21 = vsel %vm240_vm0, %v1189_v16, 0.0  ;;  %p1042_p3 = pnand %p1041_p2, %p1037_p13 }
  0x1c   : > { %267 = vmatpush.msra.mxu0 %v217_v4  ;;  %v651_v18 = vadd.f32 %v650_v12, %v649_v5  ;;  %v676_v19 = vsel %vm240_vm0, %v1186_v15, 0.0  ;;  %v223_v22 = vld [vmem:[%s1157_s29 + $0x38] sm:$0xff]  ;;  %v654_v24 = vsel %vm240_vm0, %v1195_v20, 0.0  ;;  %v222_v25 = vld [vmem:[%s1157_s29 + $0x30] sm:$0xff]  ;;  %v204_v26 = vld [vmem:[%s1162_s5 + $0x20] sm:$0xff] }
  0x1d   : > { %349 = vmatpush.msra.mxu2 %v225_v7  ;;  %v677_v23 = vadd.f32 %v676_v19, %v675_v13  ;;  %306 = vmatpush.msra.mxu1 %v223_v22  ;;  %v211_v27 = vld [vmem:[%s1162_s5 + $0x58] sm:$0xff]  ;;  %v662_v29 = vsel %vm240_vm0, %v204_v26, 0.0  ;;  %v221_v33 = vld [vmem:[%s1157_s29 + $0x28] sm:$0xff]  ;;  %v212_v35 = vld [vmem:[%s1162_s5 + $0x60] sm:$0xff] }
  0x1e   : > { %268 = vmatpush.msra.mxu0 %v216_v11  ;;  %v653_v28 = vadd.f32 %v652_v14, %v651_v18  ;;  %v680_v30 = vsel %vm240_vm0, %v211_v27, 0.0  ;;  %v231_v31 = vld [vmem:[%s1157_s29 + $0x78] sm:$0xff]  ;;  %v205_v34 = vld [vmem:[%s1162_s5 + $0x28] sm:$0xff]  ;;  %v220_v37 = vld [vmem:[%s1157_s29 + $0x20] sm:$0xff]  ;;  %v688_v40 = vsel %vm240_vm0, %v212_v35, 0.0 }
  0x1f   : > { %909 = vmatmul.msk.f32.vlgmr.msra.gmra.mxu0 %vm240_vm0, %v200_v2  ;;  %350 = vmatpush.msra.mxu2 %v224_v17  ;;  %v679_v32 = vadd.f32 %v678_v21, %v677_v23  ;;  %v230_v38 = vld [vmem:[%s1157_s29 + $0x70] sm:$0xff]  ;;  %v663_v39 = vsel %vm240_vm0, %v205_v34, 0.0  ;;  %v213_v45 = vld [vmem:[%s1162_s5 + $0x68] sm:$0xff]  ;;  %v207_v46 = vld [vmem:[%s1162_s5 + $0x38] sm:$0xff] }
  0x20   : > { %917 = vmatmul.msk.f32.vlgmr.msra.gmra.mxu2 %vm240_vm0, %v208_v9  ;;  %v1213_v36 = vadd.f32 %v654_v24, %v653_v28  ;;  %307 = vmatpush.msra.mxu1 %v222_v25  ;;  %v206_v41 = vld [vmem:[%s1162_s5 + $0x30] sm:$0xff]  ;;  %v664_v43 = vadd.f32 %v663_v39, %v662_v29  ;;  %v229_v48 = vld [vmem:[%s1157_s29 + $0x68] sm:$0xff]  ;;  %v689_v49 = vsel %vm240_vm0, %v213_v45, 0.0  ;;  %v667_v50 = vsel %vm240_vm0, %v207_v46, 0.0  ;;  %v228_v55 = vld [vmem:[%s1157_s29 + $0x60] sm:$0xff]  ;;  %s182_s29 = sand.u32 1, %s1072_s13  }
  0x21   : > { %v1220_v42 = vadd.f32 %v680_v30, %v679_v32  ;;  %388 = vmatpush.msra.mxu3 %v231_v31  ;;  %v665_v44 = vsel %vm240_vm0, %v206_v41, 0.0  ;;  %v214_v51 = vld [vmem:[%s1162_s5 + $0x70] sm:$0xff]  ;;  %469 = vmatpush.msrb.mxu0 %v233_v47  ;;  %v690_v53 = vadd.f32 %v689_v49, %v688_v40  ;;  %v215_v56 = vld [vmem:[%s1162_s5 + $0x78] sm:$0xff]  ;;  %s902_s30 = sshll.u32 %s182_s29, 2  ;;  %s810_s16 = scalar_lea.sflag [#allocation3], %s182_s29 }
  0x22   : > { %308 = vmatpush.msra.mxu1 %v221_v33  ;;  %v666_v52 = vadd.f32 %v665_v44, %v664_v43  ;;  %v691_v54 = vsel %vm240_vm0, %v214_v51, 0.0  ;;  %967 = vmatpush.msrb.mxu2 %v233_v47  ;;  %v693_v58 = vsel %vm240_vm0, %v215_v56, 0.0  ;;  %v234_v17 = vld [vmem:[%s1362_s2 + $0x10] sm:$0xff]  ;;  %s184_s6 = scalar_lea.vmem [#allocation2], %s902_s30 }
  0x23   : > { %389 = vmatpush.msra.mxu3 %v230_v38  ;;  %v692_v59 = vadd.f32 %v691_v54, %v690_v53  ;;  %470 = vmatpush.msrb.mxu0 %v232_v61  ;;  %v1015_v18 = vld [vmem:[%s1362_s2 + $0x30] ss:$0 sm:$0xff]  ;;  %s821_s10 = sshll.u32 %s184_s6, 4  ;;  %s822_s10 = int_to_ptr.vmem [resolvable:$true] %s821_s10 }
  0x24   : > { %309 = vmatpush.msra.mxu1 %v220_v37  ;;  %v1236_v57 = vadd.f32 %v667_v50, %v666_v52  ;;  %968 = vmatpush.msrb.mxu2 %v232_v61 }
  0x25   : > { %913 = vmatmul.msk.f32.vlgmr.msra.gmra.mxu1 %vm240_vm0, %v204_v26  ;;  %390 = vmatpush.msra.mxu3 %v229_v48  ;;  %v1244_v60 = vadd.f32 %v693_v58, %v692_v59 }
  0x27   : > { %910 = vmatmul.msk.f32.gmra.mxu0 %vm240_vm0, %v1173_v8  ;;  %391 = vmatpush.msra.mxu3 %v228_v55  ;;  %v237_v8 = vld [vmem:[%s1362_s2 + $0x28] sm:$0xff] }
  0x28   : > { %918 = vmatmul.msk.f32.gmra.mxu2 %vm240_vm0, %v1186_v15  ;;  %921 = vmatmul.msk.f32.vlgmr.msra.gmra.mxu3 %vm240_vm0, %v212_v35  ;;  %v236_v15 = vld [vmem:[%s1362_s2 + $0x20] sm:$0xff] }
  0x29   : > { %596 = vmatpush.msrb.mxu1 %v237_v8  ;;  %969 = vmatpush.msrb.mxu3 %v237_v8 }
  0x2b   : > { %597 = vmatpush.msrb.mxu1 %v236_v15  ;;  %970 = vmatpush.msrb.mxu3 %v236_v15 }
  0x2d   : > { %914 = vmatmul.msk.f32.gmra.mxu1 %vm240_vm0, %v205_v34 }
  0x2f   : > { %911 = vmatmul.msk.f32.gmra.mxu0 %vm240_vm0, %v1177_v10 }
  0x30   : > { %919 = vmatmul.msk.f32.gmra.mxu2 %vm240_vm0, %v1189_v16  ;;  %922 = vmatmul.msk.f32.gmra.mxu3 %vm240_vm0, %v213_v45  ;;  %v235_v16 = vld [vmem:[%s1362_s2 + $0x18] sm:$0xff] }
  0x31   : > { %598 = vmatpush.msrb.mxu1 %v235_v16  ;;  %971 = vmatpush.msrb.mxu3 %v235_v16 }
  0x33   : > { %599 = vmatpush.msrb.mxu1 %v234_v17  ;;  %972 = vmatpush.msrb.mxu3 %v234_v17 }
  0x35   : > { %915 = vmatmul.msk.f32.gmra.mxu1 %vm240_vm0, %v206_v41 }
  0x37   : > { %912 = vmatmul.msk.f32.gmra.mxu0 %vm240_vm0, %v1195_v20 }
  0x38   : > { %920 = vmatmul.msk.f32.gmra.mxu2 %vm240_vm0, %v211_v27  ;;  %923 = vmatmul.msk.f32.gmra.mxu3 %vm240_vm0, %v214_v51 }
  0x3d   : > { %916 = vmatmul.msk.f32.gmra.mxu1 %vm240_vm0, %v207_v46 }
  0x40   : > { %924 = vmatmul.msk.f32.gmra.mxu3 %vm240_vm0, %v215_v56 }
  0x9c   : > { %v270_v62 = vpop.f32.mrf.mxu0 }
  0x9d   : > { %925 = vmatmul.msk.f32.vlgmr.msrb.gmra.mxu0 %vm406_vm1, %v270_v62 }
  0xa2   : > { %v311_v5 = vpop.f32.mrf.mxu1 }
  0xa3   : > { %v352_v63 = vpop.f32.mrf.mxu2 }
  0xa4   : > { %v273_v0 = vpop.f32.mrf.mxu0 }
  0xa5   : > { %926 = vmatmul.msk.f32.gmra.mxu0 %vm406_vm1, %v273_v0 }
  0xaa   : > { %v314_v9 = vpop.f32.mrf.mxu1 }
  0xab   : > { %v355_v1 = vpop.f32.mrf.mxu2  ;;  %v393_v7 = vpop.f32.mrf.mxu3 }
  0xac   : > { %v276_v2 = vpop.f32.mrf.mxu0  ;;  %934 = vmatmul.msk.f32.vlgmr.msrb.gmra.mxu2 %vm406_vm1, %v355_v1 }
  0xad   : > { %927 = vmatmul.msk.f32.gmra.mxu0 %vm406_vm1, %v276_v2 }
  0xb2   : > { %v317_v11 = vpop.f32.mrf.mxu1 }
  0xb3   : > { %v358_v3 = vpop.f32.mrf.mxu2  ;;  %v396_v10 = vpop.f32.mrf.mxu3 }
  0xb4   : > { %v279_v4 = vpop.f32.mrf.mxu0  ;;  %935 = vmatmul.msk.f32.gmra.mxu2 %vm406_vm1, %v358_v3 }
  0xb5   : > { %928 = vmatmul.msk.f32.gmra.mxu0 %vm406_vm1, %v279_v4 }
  0xba   : > { %v320_v13 = vpop.f32.mrf.mxu1 }
  0xbb   : > { %v361_v6 = vpop.f32.mrf.mxu2  ;;  %v399_v12 = vpop.f32.mrf.mxu3 }
  0xbc   : > { %936 = vmatmul.msk.f32.gmra.mxu2 %vm406_vm1, %v361_v6 }
  0xbd   : > { %929 = vmatmul.msk.f32.gmra.mxu0 %vm406_vm1, %v311_v5 }
  0xc3   : > { %v402_v14 = vpop.f32.mrf.mxu3 }
  0xc4   : > { %937 = vmatmul.msk.f32.gmra.mxu2 %vm406_vm1, %v393_v7  ;;  %v1082_v7 = vmov 32.0  }
  0xc5   : > { %930 = vmatmul.msk.f32.gmra.mxu0 %vm406_vm1, %v314_v9  ;;  %1016 = vrcp.f32 %v1082_v7  ;;  %v656_v9 = vrot.slane %v1213_v36, 4 }
  0xcc   : > { %938 = vmatmul.msk.f32.gmra.mxu2 %vm406_vm1, %v396_v10  ;;  %v1017_v10 = vpop.eup %1016 }
  0xcd   : > { %931 = vmatmul.msk.f32.gmra.mxu0 %vm406_vm1, %v317_v11  ;;  %v657_v11 = vadd.f32 %v656_v9, %v1213_v36  ;;  %vm706_vm2 = vweird.f32 %v1017_v10 }
  0xd4   : > { %939 = vmatmul.msk.f32.gmra.mxu2 %vm406_vm1, %v399_v12 }
  0xd5   : > { %932 = vmatmul.msk.f32.gmra.mxu0 %vm406_vm1, %v320_v13  ;;  %v702_v13 = vmul.f32 32.0, %v1017_v10 }
  0xd7   : > { %v703_v15 = vsub.f32 1.0, %v702_v13 }
  0xdc   : > { %940 = vmatmul.msk.f32.gmra.mxu2 %vm406_vm1, %v402_v14  ;;  %v658_v14 = vrot.slane %v657_v11, 2 }
  0xdd   : > { %933 = vmatmul.msk.f32.gmra.mxu0 %vm406_vm1, %v352_v63 }
  0xde   : > { %v659_v16 = vadd.f32 %v658_v14, %v657_v11 }
 0x11a   : > { %v472_v19 = vpop.f32.mrf.mxu0 }
 0x11b   : > { %v473_v20 = vadd.f32 %v1015_v18, %v472_v19  ;;  %v704_v19 = vmul.f32 %v1017_v10, %v703_v15 }
 0x11d   : > { %v520_v21 = vmax.f32 %v473_v20, 0.0  ;;  %v660_v20 = vrot.slane %v659_v16, 1 }
 0x11f   : > { %941 = vmatmul.msk.f32.vlgmr.msrb.gmra.mxu1 %vm240_vm0, %v520_v21  ;;  %v661_v21 = vadd.f32 %v660_v20, %v659_v16 }
 0x122   : > { %v475_v22 = vpop.f32.mrf.mxu0 }
 0x123   : > { %v476_v23 = vadd.f32 %v1015_v18, %v475_v22 }
 0x125   : > { %v521_v24 = vmax.f32 %v476_v23, 0.0 }
 0x127   : > { %942 = vmatmul.msk.f32.gmra.mxu1 %vm240_vm0, %v521_v24 }
 0x12a   : > { %v478_v25 = vpop.f32.mrf.mxu0 }
 0x12b   : > { %v479_v26 = vadd.f32 %v1015_v18, %v478_v25 }
 0x12d   : > { %v522_v27 = vmax.f32 %v479_v26, 0.0 }
 0x12f   : > { %943 = vmatmul.msk.f32.gmra.mxu1 %vm240_vm0, %v522_v27  ;;  %v499_v28 = vpop.f32.mrf.mxu2  ;;  %v669_v27 = vrot.slane %v1236_v57, 4 }
 0x130   : > { %v500_v29 = vadd.f32 %v1015_v18, %v499_v28  ;;  %v682_v28 = vrot.slane %v1220_v42, 4 }
 0x132   : > { %v481_v30 = vpop.f32.mrf.mxu0  ;;  %v529_v31 = vmax.f32 %v500_v29, 0.0  ;;  %v670_v29 = vadd.f32 %v669_v27, %v1236_v57 }
 0x133   : > { %v482_v32 = vadd.f32 %v1015_v18, %v481_v30 }
 0x134   : > { %950 = vmatmul.msk.f32.vlgmr.msrb.gmra.mxu3 %vm240_vm0, %v529_v31  ;;  %v683_v31 = vadd.f32 %v682_v28, %v1220_v42 }
 0x135   : > { %v523_v33 = vmax.f32 %v482_v32, 0.0 }
 0x137   : > { %944 = vmatmul.msk.f32.gmra.mxu1 %vm240_vm0, %v523_v33  ;;  %v502_v34 = vpop.f32.mrf.mxu2  ;;  %v671_v33 = vrot.slane %v670_v29, 2 }
 0x138   : > { %v503_v35 = vadd.f32 %v1015_v18, %v502_v34  ;;  %v684_v34 = vrot.slane %v683_v31, 2 }
 0x13a   : > { %v484_v37 = vpop.f32.mrf.mxu0  ;;  %v530_v38 = vmax.f32 %v503_v35, 0.0  ;;  %v672_v35 = vadd.f32 %v671_v33, %v670_v29 }
 0x13b   : > { %v485_v39 = vadd.f32 %v1015_v18, %v484_v37 }
 0x13c   : > { %951 = vmatmul.msk.f32.gmra.mxu3 %vm240_vm0, %v530_v38  ;;  %v685_v38 = vadd.f32 %v684_v34, %v683_v31 }
 0x13d   : > { %v524_v40 = vmax.f32 %v485_v39, 0.0 }
 0x13f   : > { %945 = vmatmul.msk.f32.gmra.mxu1 %vm240_vm0, %v524_v40  ;;  %v505_v41 = vpop.f32.mrf.mxu2  ;;  %v673_v40 = vrot.slane %v672_v35, 1 }
 0x140   : > { %v506_v43 = vadd.f32 %v1015_v18, %v505_v41  ;;  %v686_v41 = vrot.slane %v685_v38, 1 }
 0x142   : > { %v487_v44 = vpop.f32.mrf.mxu0  ;;  %v531_v45 = vmax.f32 %v506_v43, 0.0  ;;  %v695_v43 = vrot.slane %v1244_v60, 4  ;;  %v687_v57 = vadd.f32 %v686_v41, %v685_v38 }
 0x143   : > { %v488_v46 = vadd.f32 %v1015_v18, %v487_v44  ;;  %v674_v44 = vadd.f32 %v673_v40, %v672_v35 }
 0x144   : > { %952 = vmatmul.msk.f32.gmra.mxu3 %vm240_vm0, %v531_v45  ;;  %v696_v42 = vadd.f32 %v695_v43, %v1244_v60 }
 0x145   : > { %v525_v47 = vmax.f32 %v488_v46, 0.0 }
 0x147   : > { %946 = vmatmul.msk.f32.gmra.mxu1 %vm240_vm0, %v525_v47  ;;  %v508_v48 = vpop.f32.mrf.mxu2 }
 0x148   : > { %v509_v49 = vadd.f32 %v1015_v18, %v508_v48 }
 0x14a   : > { %v490_v50 = vpop.f32.mrf.mxu0  ;;  %v532_v51 = vmax.f32 %v509_v49, 0.0  ;;  %v697_v49 = vrot.slane %v696_v42, 2 }
 0x14b   : > { %v491_v52 = vadd.f32 %v1015_v18, %v490_v50 }
 0x14c   : > { %953 = vmatmul.msk.f32.gmra.mxu3 %vm240_vm0, %v532_v51  ;;  %v698_v51 = vadd.f32 %v697_v49, %v696_v42 }
 0x14d   : > { %v526_v53 = vmax.f32 %v491_v52, 0.0 }
 0x14f   : > { %947 = vmatmul.msk.f32.gmra.mxu1 %vm240_vm0, %v526_v53  ;;  %v511_v54 = vpop.f32.mrf.mxu2  ;;  %v699_v53 = vrot.slane %v698_v51, 1 }
 0x150   : > { %v512_v55 = vadd.f32 %v1015_v18, %v511_v54 }
 0x151   : > { %v700_v54 = vadd.f32 %v699_v53, %v698_v51 }
 0x152   : > { %v493_v56 = vpop.f32.mrf.mxu0  ;;  %v533_v58 = vmax.f32 %v512_v55, 0.0 }
 0x153   : > { %v494_v59 = vadd.f32 %v1015_v18, %v493_v56  ;;  %v239_v56 = vld [vmem:[%s1362_s2 + $0x31] sm:$0x1] }
 0x154   : > { %954 = vmatmul.msk.f32.gmra.mxu3 %vm240_vm0, %v533_v58 }
 0x155   : > { %v527_v61 = vmax.f32 %v494_v59, 0.0 }
 0x157   : > { %948 = vmatmul.msk.f32.gmra.mxu1 %vm240_vm0, %v527_v61  ;;  %v514_v62 = vpop.f32.mrf.mxu2 }
 0x158   : > { %v515_v63 = vadd.f32 %v1015_v18, %v514_v62 }
 0x15a   : > { %v496_v0 = vpop.f32.mrf.mxu0  ;;  %v534_v1 = vmax.f32 %v515_v63, 0.0 }
 0x15b   : > { %v497_v2 = vadd.f32 %v1015_v18, %v496_v0 }
 0x15c   : > { %955 = vmatmul.msk.f32.gmra.mxu3 %vm240_vm0, %v534_v1 }
 0x15d   : > { %v528_v3 = vmax.f32 %v497_v2, 0.0 }
 0x15f   : > { %949 = vmatmul.msk.f32.gmra.mxu1 %vm240_vm0, %v528_v3  ;;  %v517_v4 = vpop.f32.mrf.mxu2 }
 0x160   : > { %v518_v5 = vadd.f32 %v1015_v18, %v517_v4  ;;  %v705_v18 = vadd.f32 %v1017_v10, %v704_v19 }
 0x162   : > { %v535_v6 = vmax.f32 %v518_v5, 0.0  ;;  %v707_v23 = vsel %vm706_vm2, %v1017_v10, %v705_v18 }
 0x163   : > { %v708_v25 = vmul.f32 %v707_v23, %v661_v21  ;;  %v709_v47 = vmul.f32 %v707_v23, %v674_v44  ;;  %v710_v48 = vmul.f32 %v707_v23, %v687_v57  ;;  %v711_v60 = vmul.f32 %v707_v23, %v700_v54 }
 0x164   : > { %956 = vmatmul.msk.f32.gmra.mxu3 %vm240_vm0, %v535_v6 }
 0x19c   : > { %v601_v8 = vpop.f32.mrf.mxu1 }
 0x1a4   : > { %v604_v12 = vpop.f32.mrf.mxu1 }
 0x1ac   : > { %v607_v17 = vpop.f32.mrf.mxu1 }
 0x1b4   : > { %v610_v22 = vpop.f32.mrf.mxu1 }
 0x1b5   : > { %727 = vmatpush.msra.mxu2 %v610_v22 }
 0x1b7   : > { %728 = vmatpush.msra.mxu2 %v607_v17  ;;  %v628_v24 = vpop.f32.mrf.mxu3 }
 0x1b9   : > { %729 = vmatpush.msra.mxu2 %v604_v12 }
 0x1bb   : > { %730 = vmatpush.msra.mxu2 %v601_v8 }
 0x1bc   : > { %v613_v36 = vpop.f32.mrf.mxu1  ;;  %957 = vmatmul.msk.f32.vlgmr.msra.gmra.mxu2 %vm240_vm0, %v708_v25 }
 0x1bf   : > { %v631_v26 = vpop.f32.mrf.mxu3 }
 0x1c4   : > { %v616_v30 = vpop.f32.mrf.mxu1 }
 0x1c7   : > { %v634_v32 = vpop.f32.mrf.mxu3 }
 0x1c8   : > { %773 = vmatpush.msrb.mxu2 %v634_v32 }
 0x1ca   : > { %774 = vmatpush.msrb.mxu2 %v631_v26 }
 0x1cc   : > { %v619_v37 = vpop.f32.mrf.mxu1  ;;  %775 = vmatpush.msrb.mxu2 %v628_v24 }
 0x1cf   : > { %v637_v39 = vpop.f32.mrf.mxu3 }
 0x1d4   : > { %v622_v45 = vpop.f32.mrf.mxu1 }
 0x1d5   : > { %750 = vmatpush.msra.mxu3 %v622_v45 }
 0x1d7   : > { %751 = vmatpush.msra.mxu3 %v619_v37  ;;  %v640_v46 = vpop.f32.mrf.mxu3 }
 0x1d9   : > { %752 = vmatpush.msra.mxu3 %v616_v30 }
 0x1db   : > { %753 = vmatpush.msra.mxu3 %v613_v36 }
 0x1dc   : > { %v625_v50 = vpop.f32.mrf.mxu1  ;;  %958 = vmatmul.msk.f32.vlgmr.msra.gmra.mxu3 %vm240_vm0, %v709_v47 }
 0x1dd   : > { %776 = vmatpush.msrb.mxu2 %v625_v50 }
 0x1de   : > { %959 = vmatmul.msk.f32.vlgmr.msrb.gmra.mxu2 %vm240_vm0, %v710_v48 }
 0x1df   : > { %v643_v52 = vpop.f32.mrf.mxu3 }
 0x1e7   : > { %v646_v55 = vpop.f32.mrf.mxu3 }
 0x1e8   : > { %796 = vmatpush.msrb.mxu3 %v646_v55 }
 0x1ea   : > { %797 = vmatpush.msrb.mxu3 %v643_v52 }
 0x1ec   : > { %798 = vmatpush.msrb.mxu3 %v640_v46 }
 0x1ee   : > { %799 = vmatpush.msrb.mxu3 %v637_v39 }
 0x1ef   : > { %960 = vmatmul.msk.f32.vlgmr.msrb.gmra.mxu3 %vm240_vm0, %v711_v60 }
 0x23f   : > { %v732_v58 = vpop.f32.mrf.mxu2 }
 0x240   : > { %v733_v59 = vadd.f32 %v732_v58, %v239_v56 }
 0x242   : > { %805 = vst.msk [vmem:[%s184_s6] sm:$0x1] %vm804_vm3, %v733_v59 }
 0x25f   : > { %v755_v61 = vpop.f32.mrf.mxu3 }
 0x260   : > { %v756_v62 = vadd.f32 %v755_v61, %v239_v56 }
 0x261   : > { %v778_v63 = vpop.f32.mrf.mxu2 }
 0x262   : > { %806 = vst.msk [vmem:[%s184_s6 + $0x1] sm:$0x1] %vm804_vm3, %v756_v62  ;;  %v779_v0 = vadd.f32 %v778_v63, %v239_v56 }
 0x264   : > { %807 = vst.msk [vmem:[%s184_s6 + $0x2] sm:$0x1] %vm804_vm3, %v779_v0 }
 0x272   : > { %v801_v1 = vpop.f32.mrf.mxu3 }
 0x273   : > { %v802_v2 = vadd.f32 %v801_v1, %v239_v56 }
 0x275   : > { %808 = vst.msk [vmem:[%s184_s6 + $0x3] sm:$0x1] %vm804_vm3, %v802_v2 }
 0x276   : > { %1045 = shalt.err (!%p1042_p3)
}
 0x277   : > { %s1083_s28 = smov 16   ;;  %s1084_s29 = smov 1  }
 0x278   : > { %973 = dma.vmem_to_hbm [thread:$0]  (%p1140_p5), %s822_s10, 64, %s824_s11, %s810_s16, %s1083_s28, %s1083_s28, %s1084_s29  }
 0x279 PF: > { %p979_p4 = scmp.ge.s32.totalorder %s1080_s15, 2  ;;  %s838_s30 = sand.u32 1, %s1068_s12  }
 0x27a   : > { %s839_s4 = scalar_lea.sflag [#allocation3], %s838_s30 }
 0x27b   : > { %p976_p7 = pnand %p979_p4, %p1144_p6 }
 0x27d   : > { %p977_p8 = pneg %p976_p7 }
 0x27f   : > { %1063 = dma.done.wait (%p977_p8), %s839_s4, 64  }
 0x280   : > { %1065 = vsyncadd (%p977_p8), %s839_s4, 4294967232  ;;  %p13_p9 = scmp.ge.s32.totalorder %s1128_s18, 4   ;;  %s1366_s12 = smov %s1072_s13 }
 0x281   : > { %s1367_s13 = smov %s1076_s14  ;;  %s1368_s14 = smov %s1138_s21 }
 0x282   : > { %s1369_s15 = smov %s1128_s18  ;;  %15 = sbr.rel (!%p13_p9) target bundleno = 3 (0x3), region = 70 }
 0x287   :  { %845 = vsyncpa [#allocation3], 1 }
 0x288   :  { %847 = vsyncpa [#allocation3 + $0x1], 1 }

</bundles_post_ra>
